<compile_context>
chip_gen: v5e
topology: v5e:2x2
jax: 0.10.0
libtpu: 0.0.40
codegen_flags: <defaults>
</compile_context>

<pallas_src>
import jax
import jax.numpy as jnp
from jax.experimental import pallas as pl
from jax.experimental.pallas import tpu as pltpu


def _round_up(x, m):
    return ((x + m - 1) // m) * m


def _mlp_kernel(x_ref, w1_ref, b1_ref, w2_ref, b2_ref, w3_ref, b3_ref, o_ref):
    # Layer 1: Linear(input_size, 64) + ReLU.  bf16 operands, f32 accumulation.
    h1 = jnp.dot(x_ref[...], w1_ref[...], preferred_element_type=jnp.float32)
    h1 = jnp.maximum(h1 + b1_ref[...], 0.0)                       # (TB, 64) f32

    # Layer 2: Linear(64, 32) + ReLU.
    h2 = jnp.dot(h1.astype(jnp.bfloat16), w2_ref[...],
                 preferred_element_type=jnp.float32)
    h2 = jnp.maximum(h2 + b2_ref[...], 0.0)                       # (TB, 32) f32

    # Output layer: Linear(32, 1) + Sigmoid, computed transposed so the result
    # is (1, TB) (lane-dense) rather than (TB, 1): w3_row (1, 32) contracted
    # against h2's feature dim (the q @ k.T pattern).
    logit = jax.lax.dot_general(
        w3_ref[...], h2.astype(jnp.bfloat16),
        dimension_numbers=(((1,), (1,)), ((), ())),
        preferred_element_type=jnp.float32)                       # (1, TB)
    z = logit + b3_ref[...]
    # sigmoid(z) = 1 / (1 + exp(-z)); exp and reciprocal both go to the EUP.
    o_ref[...] = pl.reciprocal(1.0 + jnp.exp(-z), approx=True).astype(o_ref.dtype)


def two_layer_net(x, w1, b1, w2, b2, w3_row, b3, *, tb=512):
    """x: (B, input_size); returns (B, 1) f32, matching TwoLayerNet.forward.

    w1: (in, 64), w2: (64, 32) stored (in, out); w3_row: (1, 32) PyTorch row
    layout; biases b1 (1, 64), b2 (1, 32), b3 (1, 1).
    """
    B, in_dim = x.shape

    # Tile size: multiple of 128 (lane-dense output stores), capped by padded B.
    tb = min(tb, _round_up(B, 128))
    b_pad = _round_up(B, tb)
    num_tiles = b_pad // tb

    # bf16 operands for the MXU; biases / elementwise math stay f32.
    xb = x.astype(jnp.bfloat16)
    if b_pad != B:
        xb = jnp.pad(xb, ((0, b_pad - B), (0, 0)))
    w1b = w1.astype(jnp.bfloat16)
    w2b = w2.astype(jnp.bfloat16)
    w3b = w3_row.astype(jnp.bfloat16)
    b1f = b1.astype(jnp.float32)
    b2f = b2.astype(jnp.float32)
    b3f = b3.astype(jnp.float32)

    # Constant index_map -> block index never changes -> stays VMEM-resident.
    const = lambda shape: pl.BlockSpec(shape, lambda i: tuple(0 for _ in shape))

    flops = 2 * b_pad * (in_dim * 64 + 64 * 32 + 32 * 1)
    bytes_accessed = (
        b_pad * in_dim * 2                                   # x (bf16)
        + (w1b.size + w2b.size + w3b.size) * 2               # weights (bf16)
        + (b1f.size + b2f.size + b3f.size) * 4               # biases (f32)
        + b_pad * 4                                          # output (f32)
    )

    out = pl.pallas_call(
        _mlp_kernel,
        out_shape=jax.ShapeDtypeStruct((1, b_pad), jnp.float32),
        grid=(num_tiles,),
        in_specs=[
            pl.BlockSpec((tb, in_dim), lambda i: (i, 0)),    # x: blocked on batch
            const(w1b.shape), const(b1f.shape),
            const(w2b.shape), const(b2f.shape),
            const(w3b.shape), const(b3f.shape),
        ],
        out_specs=pl.BlockSpec((1, tb), lambda i: (0, i)),   # lane-dense output
        compiler_params=pltpu.CompilerParams(
            dimension_semantics=("parallel",),
            vmem_limit_bytes=32 * 1024 * 1024,
        ),
        cost_estimate=pl.CostEstimate(
            flops=flops, transcendentals=b_pad, bytes_accessed=bytes_accessed),
    )(xb, w1b, b1f, w2b, b2f, w3b, b3f)

    return out[0, :B].reshape(B, 1)


def init_params(key, input_size):
    """nn.Linear-style init; w1/w2 stored (in, out) so the kernel computes
    x @ W, w3 kept in PyTorch's (out=1, in=32) row form for the lane-dense
    final matmul."""
    ks = jax.random.split(key, 6)

    def uinit(k, shape, fan_in):
        bound = 1.0 / jnp.sqrt(fan_in)
        return jax.random.uniform(k, shape, jnp.float32, -bound, bound)

    w1 = uinit(ks[0], (input_size, 64), input_size)
    b1 = uinit(ks[1], (1, 64), input_size)
    w2 = uinit(ks[2], (64, 32), 64)
    b2 = uinit(ks[3], (1, 32), 64)
    w3 = uinit(ks[4], (1, 32), 32)      # row form: (out_features, in_features)
    b3 = uinit(ks[5], (1, 1), 32)
    return w1, b1, w2, b2, w3, b3


if __name__ == "__main__":
    key = jax.random.PRNGKey(0)
    k_x, k_p = jax.random.split(key)

    batch, input_size = 200, 16          # non-multiple of the tile: exercises padding
    x = jax.random.normal(k_x, (batch, input_size), jnp.float32)
    params = init_params(k_p, input_size)

    out = jax.block_until_ready(two_layer_net(x, *params))
    assert out.shape == (batch, 1)

    w1, b1, w2, b2, w3r, b3 = params
    bf = lambda a: a.astype(jnp.bfloat16)

    # Reference with identical bf16 operand rounding / f32 accumulation.
    h = jnp.maximum(jnp.dot(bf(x), bf(w1), preferred_element_type=jnp.float32) + b1, 0.0)
    h = jnp.maximum(jnp.dot(bf(h), bf(w2), preferred_element_type=jnp.float32) + b2, 0.0)
    ref = jax.nn.sigmoid(
        jnp.dot(bf(h), bf(w3r).T, preferred_element_type=jnp.float32) + b3)
    assert jnp.allclose(out, ref, atol=3e-3), "mismatch vs bf16-operand reference"

    # Sanity check vs the full-f32 forward pass (module semantics).
    hf = jnp.maximum(x @ w1 + b1, 0.0)
    hf = jnp.maximum(hf @ w2 + b2, 0.0)
    ref_f32 = jax.nn.sigmoid(hf @ w3r.T + b3)
    assert jnp.allclose(out, ref_f32, atol=5e-2), "mismatch vs f32 reference"

    print("KERNEL_OK")
</pallas_src>

<mosaic_0001>
module attributes {stable_mosaic.version = 11 : i64} {
  func.func @_mlp_kernel(%arg0: i32, %arg1: memref<256x16xbf16, #tpu.memory_space<vmem>>, %arg2: memref<16x64xbf16, #tpu.memory_space<vmem>>, %arg3: memref<1x64xf32, #tpu.memory_space<vmem>>, %arg4: memref<64x32xbf16, #tpu.memory_space<vmem>>, %arg5: memref<1x32xf32, #tpu.memory_space<vmem>>, %arg6: memref<1x32xbf16, #tpu.memory_space<vmem>>, %arg7: memref<1x1xf32, #tpu.memory_space<vmem>>, %arg8: memref<1x256xf32, #tpu.memory_space<vmem>>) attributes {dimension_semantics = [#tpu.dimension_semantics<parallel>], iteration_bounds = array<i64: 1>, scalar_prefetch = 0 : i64, scratch_operands = 0 : i64, tpu.core_type = #tpu.core_type<tc>, window_params = [{transform_indices = @transform_0, window_bounds = array<i64: 256, 16>}, {pipeline_mode = #tpu.pipeline_mode<synchronous>, transform_indices = @transform_1, window_bounds = array<i64: 16, 64>}, {pipeline_mode = #tpu.pipeline_mode<synchronous>, transform_indices = @transform_2, window_bounds = array<i64: 1, 64>}, {pipeline_mode = #tpu.pipeline_mode<synchronous>, transform_indices = @transform_3, window_bounds = array<i64: 64, 32>}, {pipeline_mode = #tpu.pipeline_mode<synchronous>, transform_indices = @transform_4, window_bounds = array<i64: 1, 32>}, {pipeline_mode = #tpu.pipeline_mode<synchronous>, transform_indices = @transform_5, window_bounds = array<i64: 1, 32>}, {pipeline_mode = #tpu.pipeline_mode<synchronous>, transform_indices = @transform_6, window_bounds = array<i64: 1, 1>}, {transform_indices = @transform_7, window_bounds = array<i64: 1, 256>}]} {
    %c0 = arith.constant 0 : index
    %c0_0 = arith.constant 0 : index
    %0 = vector.load %arg1[%c0, %c0_0] : memref<256x16xbf16, #tpu.memory_space<vmem>>, vector<256x16xbf16>
    %c0_1 = arith.constant 0 : index
    %c0_2 = arith.constant 0 : index
    %1 = vector.load %arg2[%c0_1, %c0_2] : memref<16x64xbf16, #tpu.memory_space<vmem>>, vector<16x64xbf16>
    %cst = arith.constant dense<0.000000e+00> : vector<256x64xf32>
    %2 = tpu.matmul %0, %1, %cst {dimension_numbers = #tpu.dot_dimension_numbers<[1], [0], [0], [1], [0, 0, 1, 1], [], []>} : vector<256x16xbf16>, vector<16x64xbf16>, vector<256x64xf32> -> vector<256x64xf32>
    %c0_3 = arith.constant 0 : index
    %c0_4 = arith.constant 0 : index
    %3 = vector.load %arg3[%c0_3, %c0_4] : memref<1x64xf32, #tpu.memory_space<vmem>>, vector<1x64xf32>
    %4 = vector.broadcast %3 : vector<1x64xf32> to vector<256x64xf32>
    %5 = arith.addf %2, %4 : vector<256x64xf32>
    %cst_5 = arith.constant 0.000000e+00 : f32
    %6 = vector.broadcast %cst_5 : f32 to vector<256x64xf32>
    %7 = arith.maximumf %5, %6 : vector<256x64xf32>
    %8 = arith.truncf %7 : vector<256x64xf32> to vector<256x64xbf16>
    %c0_6 = arith.constant 0 : index
    %c0_7 = arith.constant 0 : index
    %9 = vector.load %arg4[%c0_6, %c0_7] : memref<64x32xbf16, #tpu.memory_space<vmem>>, vector<64x32xbf16>
    %cst_8 = arith.constant dense<0.000000e+00> : vector<256x32xf32>
    %10 = tpu.matmul %8, %9, %cst_8 {dimension_numbers = #tpu.dot_dimension_numbers<[1], [0], [0], [1], [0, 0, 1, 1], [], []>} : vector<256x64xbf16>, vector<64x32xbf16>, vector<256x32xf32> -> vector<256x32xf32>
    %c0_9 = arith.constant 0 : index
    %c0_10 = arith.constant 0 : index
    %11 = vector.load %arg5[%c0_9, %c0_10] : memref<1x32xf32, #tpu.memory_space<vmem>>, vector<1x32xf32>
    %12 = vector.broadcast %11 : vector<1x32xf32> to vector<256x32xf32>
    %13 = arith.addf %10, %12 : vector<256x32xf32>
    %cst_11 = arith.constant 0.000000e+00 : f32
    %14 = vector.broadcast %cst_11 : f32 to vector<256x32xf32>
    %15 = arith.maximumf %13, %14 : vector<256x32xf32>
    %c0_12 = arith.constant 0 : index
    %c0_13 = arith.constant 0 : index
    %16 = vector.load %arg6[%c0_12, %c0_13] : memref<1x32xbf16, #tpu.memory_space<vmem>>, vector<1x32xbf16>
    %17 = arith.truncf %15 : vector<256x32xf32> to vector<256x32xbf16>
    %cst_14 = arith.constant dense<0.000000e+00> : vector<1x256xf32>
    %18 = tpu.matmul %16, %17, %cst_14 {dimension_numbers = #tpu.dot_dimension_numbers<[1], [1], [0], [0], [0, 0, 1, 0], [], []>} : vector<1x32xbf16>, vector<256x32xbf16>, vector<1x256xf32> -> vector<1x256xf32>
    %c0_15 = arith.constant 0 : index
    %c0_16 = arith.constant 0 : index
    %19 = vector.load %arg7[%c0_15, %c0_16] : memref<1x1xf32, #tpu.memory_space<vmem>>, vector<1x1xf32>
    %20 = vector.broadcast %19 : vector<1x1xf32> to vector<1x256xf32>
    %21 = arith.addf %18, %20 : vector<1x256xf32>
    %cst_17 = arith.constant 0.000000e+00 : f32
    %22 = vector.broadcast %cst_17 : f32 to vector<1x256xf32>
    %23 = arith.subf %22, %21 : vector<1x256xf32>
    %24 = math.exp %23 : vector<1x256xf32>
    %cst_18 = arith.constant 1.000000e+00 : f32
    %25 = vector.broadcast %cst_18 : f32 to vector<1x256xf32>
    %26 = arith.addf %25, %24 : vector<1x256xf32>
    %27 = tpu.reciprocal %26 {approx = true} : vector<1x256xf32> -> vector<1x256xf32>
    %c0_19 = arith.constant 0 : index
    %c0_20 = arith.constant 0 : index
    %28 = vector.load %arg8[%c0_19, %c0_20] : memref<1x256xf32, #tpu.memory_space<vmem>>, vector<1x256xf32>
    tpu.vector_store %arg8[%c0_19, %c0_20], %27 {strides = array<i32>} : memref<1x256xf32, #tpu.memory_space<vmem>>, vector<1x256xf32>,
    return
  }
  func.func @transform_0(%arg0: i32) -> (i32, i32) {
    %c0_i32 = arith.constant 0 : i32
    %c0_i32_0 = arith.constant 0 : i32
    return %arg0, %c0_i32 : i32, i32
  }
  func.func @transform_1(%arg0: i32) -> (i32, i32) {
    %c0_i32 = arith.constant 0 : i32
    %c0_i32_0 = arith.constant 0 : i32
    %c0_i32_1 = arith.constant 0 : i32
    return %c0_i32, %c0_i32_0 : i32, i32
  }
  func.func @transform_2(%arg0: i32) -> (i32, i32) {
    %c0_i32 = arith.constant 0 : i32
    %c0_i32_0 = arith.constant 0 : i32
    %c0_i32_1 = arith.constant 0 : i32
    return %c0_i32, %c0_i32_0 : i32, i32
  }
  func.func @transform_3(%arg0: i32) -> (i32, i32) {
    %c0_i32 = arith.constant 0 : i32
    %c0_i32_0 = arith.constant 0 : i32
    %c0_i32_1 = arith.constant 0 : i32
    return %c0_i32, %c0_i32_0 : i32, i32
  }
  func.func @transform_4(%arg0: i32) -> (i32, i32) {
    %c0_i32 = arith.constant 0 : i32
    %c0_i32_0 = arith.constant 0 : i32
    %c0_i32_1 = arith.constant 0 : i32
    return %c0_i32, %c0_i32_0 : i32, i32
  }
  func.func @transform_5(%arg0: i32) -> (i32, i32) {
    %c0_i32 = arith.constant 0 : i32
    %c0_i32_0 = arith.constant 0 : i32
    %c0_i32_1 = arith.constant 0 : i32
    return %c0_i32, %c0_i32_0 : i32, i32
  }
  func.func @transform_6(%arg0: i32) -> (i32, i32) {
    %c0_i32 = arith.constant 0 : i32
    %c0_i32_0 = arith.constant 0 : i32
    %c0_i32_1 = arith.constant 0 : i32
    return %c0_i32, %c0_i32_0 : i32, i32
  }
  func.func @transform_7(%arg0: i32) -> (i32, i32) {
    %c0_i32 = arith.constant 0 : i32
    %c0_i32_0 = arith.constant 0 : i32
    return %c0_i32, %arg0 : i32, i32
  }
}

</mosaic_0001>

<bundles_post_ra>
// kernel: tpu_custom_call.1
= control target key start
LH: loop header
LB: loop body
LE: loop exit
PB: predicated region body
PF: predicated region fallthrough
CT: control target
= control target key end

     0   :  { %s1127_s0 = inlined_call_operand.vmem [shape: bf16[256,16], index: 0, kind: input, shape index: {}]   ;;  %s1128_s1 = inlined_call_operand.vmem [shape: bf16[16,64], index: 1, kind: input, shape index: {}]   ;;  %s1129_s2 = inlined_call_operand.vmem [shape: f32[1,64], index: 2, kind: input, shape index: {}]   ;;  %s1130_s3 = inlined_call_operand.vmem [shape: bf16[64,32], index: 3, kind: input, shape index: {}]   ;;  %s1131_s4 = inlined_call_operand.vmem [shape: f32[1,32], index: 4, kind: input, shape index: {}]   ;;  %s1132_s5 = inlined_call_operand.vmem [shape: bf16[1,32], index: 5, kind: input, shape index: {}]   ;;  %s1133_s6 = inlined_call_operand.<no memory space> [shape: f32[1,1], index: 6, kind: input, shape index: {}]   ;;  %s1134_s7 = inlined_call_operand.hbm [shape: f32[1,256], index: 7, kind: output, shape index: {}]  }
   0x1   :  { %v12_v0 = vstv %s1133_s6 }
   0x2   :  { %13 = vst [vmem:[#allocation2] sm:$0x1] %v12_v0 }
   0x3   :  { %v819_v1 = vld [vmem:[%s1128_s1] sm:$0xff]  ;;  %vm154_vm0 = vcmask 130048   ;;  %v812_v3 = vld [vmem:[%s1127_s0 + $0x48] sm:$0xff] }
   0x4   :  { %v803_v2 = vld [vmem:[%s1127_s0] sm:$0xff]  ;;  %210 = vmatpush.bf16.msra.mxu0 %v819_v1  ;;  %824 = vmatpush.bf16.msra.mxu3 %v819_v1 }
   0x5   :  { %14 = vsyncpa [#allocation4], 0  ;;  %v804_v4 = vld [vmem:[%s1127_s0 + $0x8] sm:$0xff]  ;;  %v813_v5 = vld [vmem:[%s1127_s0 + $0x50] sm:$0xff]  ;;  %vm376_vm1 = vcmask 523264   ;;  %vm570_vm2 = vcmask 261120  }
   0x6   :  { %v805_v6 = vld [vmem:[%s1127_s0 + $0x10] sm:$0xff]  ;;  %v814_v7 = vld [vmem:[%s1127_s0 + $0x58] sm:$0xff]  ;;  %v815_v9 = vld [vmem:[%s1127_s0 + $0x60] sm:$0xff]  ;;  %s676_s23 = sshll.u32 %s1134_s7, 4  ;;  %vm661_vm3 = vcmask 1040384   ;;  %s677_s23 = int_to_ptr.hbm [resolvable:$true] %s676_s23 }
   0x7   :  { %753 = vmatmul.msk.bf16.vlgmr.msra.gmra.mxu0 %vm154_vm0, %v803_v2  ;;  %762 = vmatmul.msk.bf16.vlgmr.msra.gmra.mxu3 %vm154_vm0, %v812_v3  ;;  %v806_v8 = vld [vmem:[%s1127_s0 + $0x18] sm:$0xff]  ;;  %v807_v10 = vld [vmem:[%s1127_s0 + $0x20] sm:$0xff]  ;;  %v816_v11 = vld [vmem:[%s1127_s0 + $0x68] sm:$0xff] }
   0x8   :  { %v808_v12 = vld [vmem:[%s1127_s0 + $0x28] sm:$0xff]  ;;  %v817_v13 = vld [vmem:[%s1127_s0 + $0x70] sm:$0xff]  ;;  %v823_v14 = vld [vmem:[%s1130_s3 + $0x18] sm:$0xff] }
   0x9   :  { %v809_v15 = vld [vmem:[%s1127_s0 + $0x30] sm:$0xff]  ;;  %v818_v16 = vld [vmem:[%s1127_s0 + $0x78] sm:$0xff]  ;;  %429 = vmatpush.bf16.msra.mxu1 %v823_v14  ;;  %825 = vmatpush.bf16.msra.mxu2 %v823_v14  ;;  %v821_v18 = vld [vmem:[%s1130_s3 + $0x8] sm:$0xff] }
   0xa   :  { %v822_v17 = vld [vmem:[%s1130_s3 + $0x10] sm:$0xff]  ;;  %v820_v19 = vld [vmem:[%s1130_s3] sm:$0xff]  ;;  %v810_v20 = vld [vmem:[%s1127_s0 + $0x38] sm:$0xff] }
   0xb   :  { %v811_v21 = vld [vmem:[%s1127_s0 + $0x40] sm:$0xff] }
   0xc   :  { %v994_v23 = vld [vmem:[%s1129_s2] ss:$0 sm:$0xff] }
   0xd   :  { %430 = vmatpush.bf16.msra.mxu1 %v822_v17  ;;  %826 = vmatpush.bf16.msra.mxu2 %v822_v17 }
  0x11   :  { %431 = vmatpush.bf16.msra.mxu1 %v821_v18  ;;  %827 = vmatpush.bf16.msra.mxu2 %v821_v18 }
  0x15   :  { %432 = vmatpush.bf16.msra.mxu1 %v820_v19  ;;  %828 = vmatpush.bf16.msra.mxu2 %v820_v19 }
  0x17   :  { %754 = vmatmul.msk.bf16.gmra.mxu0 %vm154_vm0, %v804_v4  ;;  %763 = vmatmul.msk.bf16.gmra.mxu3 %vm154_vm0, %v813_v5 }
  0x27   :  { %755 = vmatmul.msk.bf16.gmra.mxu0 %vm154_vm0, %v805_v6  ;;  %764 = vmatmul.msk.bf16.gmra.mxu3 %vm154_vm0, %v814_v7 }
  0x37   :  { %756 = vmatmul.msk.bf16.gmra.mxu0 %vm154_vm0, %v806_v8  ;;  %765 = vmatmul.msk.bf16.gmra.mxu3 %vm154_vm0, %v815_v9 }
  0x47   :  { %757 = vmatmul.msk.bf16.gmra.mxu0 %vm154_vm0, %v807_v10  ;;  %766 = vmatmul.msk.bf16.gmra.mxu3 %vm154_vm0, %v816_v11 }
  0x57   :  { %758 = vmatmul.msk.bf16.gmra.mxu0 %vm154_vm0, %v808_v12  ;;  %767 = vmatmul.msk.bf16.gmra.mxu3 %vm154_vm0, %v817_v13 }
  0x67   :  { %759 = vmatmul.msk.bf16.gmra.mxu0 %vm154_vm0, %v809_v15  ;;  %768 = vmatmul.msk.bf16.gmra.mxu3 %vm154_vm0, %v818_v16 }
  0x77   :  { %760 = vmatmul.msk.bf16.gmra.mxu0 %vm154_vm0, %v810_v20 }
  0x84   :  { %v212_v22 = vpop.f32.mrf.mxu0 }
  0x85   :  { %v213_v25 = vadd.f32 %v994_v23, %v212_v22 }
  0x87   :  { %761 = vmatmul.msk.bf16.gmra.mxu0 %vm154_vm0, %v811_v21  ;;  %v292_v28 = vmax.f32 %v213_v25, 0.0 }
  0x8a   :  { %v257_v24 = vpop.f32.mrf.mxu3 }
  0x8b   :  { %v258_v30 = vadd.f32 %v994_v23, %v257_v24 }
  0x8c   :  { %v214_v26 = vpop.f32.mrf.mxu0 }
  0x8d   :  { %v215_v27 = vadd.f32 %v994_v23, %v214_v26  ;;  %v310_v35 = vmax.f32 %v258_v30, 0.0 }
  0x8f   :  { %v293_v29 = vmax.f32 %v215_v27, 0.0 }
  0x91   :  { %v324_v31 = vpack.c.bf16 %v293_v29, %v292_v28 }
  0x92   :  { %v259_v32 = vpop.f32.mrf.mxu3 }
  0x93   :  { %v260_v33 = vadd.f32 %v994_v23, %v259_v32  ;;  %785 = vmatmul.msk.bf16.vlgmr.msra.gmra.mxu1 %vm376_vm1, %v324_v31 }
  0x94   :  { %v217_v34 = vpop.f32.mrf.mxu0 }
  0x95   :  { %v311_v36 = vmax.f32 %v260_v33, 0.0  ;;  %v218_v39 = vadd.f32 %v994_v23, %v217_v34 }
  0x97   :  { %v1002_v37 = vpack.c.bf16 %v311_v36, %v310_v35  ;;  %v294_v42 = vmax.f32 %v218_v39, 0.0 }
  0x9a   :  { %v262_v38 = vpop.f32.mrf.mxu3 }
  0x9b   :  { %v263_v44 = vadd.f32 %v994_v23, %v262_v38 }
  0x9c   :  { %v219_v40 = vpop.f32.mrf.mxu0 }
  0x9d   :  { %v220_v41 = vadd.f32 %v994_v23, %v219_v40  ;;  %v312_v49 = vmax.f32 %v263_v44, 0.0 }
  0x9f   :  { %v295_v43 = vmax.f32 %v220_v41, 0.0 }
  0xa1   :  { %v325_v45 = vpack.c.bf16 %v295_v43, %v294_v42 }
  0xa2   :  { %v264_v46 = vpop.f32.mrf.mxu3 }
  0xa3   :  { %v265_v47 = vadd.f32 %v994_v23, %v264_v46  ;;  %786 = vmatmul.msk.bf16.gmra.mxu1 %vm376_vm1, %v325_v45 }
  0xa4   :  { %v222_v48 = vpop.f32.mrf.mxu0 }
  0xa5   :  { %v313_v50 = vmax.f32 %v265_v47, 0.0  ;;  %v223_v53 = vadd.f32 %v994_v23, %v222_v48 }
  0xa7   :  { %v334_v51 = vpack.c.bf16 %v313_v50, %v312_v49  ;;  %v296_v56 = vmax.f32 %v223_v53, 0.0 }
  0xa9   :  { %795 = vmatmul.msk.bf16.vlgmr.msra.gmra.mxu2 %vm376_vm1, %v334_v51 }
  0xaa   :  { %v267_v52 = vpop.f32.mrf.mxu3 }
  0xab   :  { %v268_v58 = vadd.f32 %v994_v23, %v267_v52 }
  0xac   :  { %v224_v54 = vpop.f32.mrf.mxu0 }
  0xad   :  { %v225_v55 = vadd.f32 %v994_v23, %v224_v54  ;;  %v314_v63 = vmax.f32 %v268_v58, 0.0 }
  0xaf   :  { %v297_v57 = vmax.f32 %v225_v55, 0.0 }
  0xb1   :  { %v326_v59 = vpack.c.bf16 %v297_v57, %v296_v56 }
  0xb2   :  { %v269_v60 = vpop.f32.mrf.mxu3 }
  0xb3   :  { %v270_v61 = vadd.f32 %v994_v23, %v269_v60  ;;  %787 = vmatmul.msk.bf16.gmra.mxu1 %vm376_vm1, %v326_v59 }
  0xb4   :  { %v227_v62 = vpop.f32.mrf.mxu0 }
  0xb5   :  { %v315_v0 = vmax.f32 %v270_v61, 0.0  ;;  %v228_v3 = vadd.f32 %v994_v23, %v227_v62 }
  0xb7   :  { %v335_v1 = vpack.c.bf16 %v315_v0, %v314_v63  ;;  %v298_v6 = vmax.f32 %v228_v3, 0.0 }
  0xb9   :  { %796 = vmatmul.msk.bf16.gmra.mxu2 %vm376_vm1, %v335_v1 }
  0xba   :  { %v272_v2 = vpop.f32.mrf.mxu3 }
  0xbb   :  { %v273_v8 = vadd.f32 %v994_v23, %v272_v2 }
  0xbc   :  { %v229_v4 = vpop.f32.mrf.mxu0 }
  0xbd   :  { %v230_v5 = vadd.f32 %v994_v23, %v229_v4  ;;  %v316_v13 = vmax.f32 %v273_v8, 0.0 }
  0xbf   :  { %v299_v7 = vmax.f32 %v230_v5, 0.0 }
  0xc1   :  { %v327_v9 = vpack.c.bf16 %v299_v7, %v298_v6 }
  0xc2   :  { %v274_v10 = vpop.f32.mrf.mxu3 }
  0xc3   :  { %v275_v11 = vadd.f32 %v994_v23, %v274_v10  ;;  %788 = vmatmul.msk.bf16.gmra.mxu1 %vm376_vm1, %v327_v9  ;;  %v1048_v10 = vld [vmem:[%s1131_s4] ss:$0 sm:$0xff] }
  0xc4   :  { %v232_v12 = vpop.f32.mrf.mxu0 }
  0xc5   :  { %v317_v14 = vmax.f32 %v275_v11, 0.0  ;;  %v233_v17 = vadd.f32 %v994_v23, %v232_v12 }
  0xc7   :  { %v336_v15 = vpack.c.bf16 %v317_v14, %v316_v13  ;;  %v300_v20 = vmax.f32 %v233_v17, 0.0 }
  0xc9   :  { %797 = vmatmul.msk.bf16.gmra.mxu2 %vm376_vm1, %v336_v15 }
  0xca   :  { %v277_v16 = vpop.f32.mrf.mxu3 }
  0xcb   :  { %v278_v22 = vadd.f32 %v994_v23, %v277_v16 }
  0xcc   :  { %v234_v18 = vpop.f32.mrf.mxu0 }
  0xcd   :  { %v235_v19 = vadd.f32 %v994_v23, %v234_v18  ;;  %v318_v28 = vmax.f32 %v278_v22, 0.0 }
  0xcf   :  { %v301_v21 = vmax.f32 %v235_v19, 0.0 }
  0xd1   :  { %v328_v24 = vpack.c.bf16 %v301_v21, %v300_v20 }
  0xd2   :  { %v279_v25 = vpop.f32.mrf.mxu3 }
  0xd3   :  { %v280_v26 = vadd.f32 %v994_v23, %v279_v25  ;;  %789 = vmatmul.msk.bf16.gmra.mxu1 %vm376_vm1, %v328_v24 }
  0xd4   :  { %v237_v27 = vpop.f32.mrf.mxu0 }
  0xd5   :  { %v319_v29 = vmax.f32 %v280_v26, 0.0  ;;  %v238_v32 = vadd.f32 %v994_v23, %v237_v27 }
  0xd7   :  { %v337_v30 = vpack.c.bf16 %v319_v29, %v318_v28  ;;  %v302_v35 = vmax.f32 %v238_v32, 0.0 }
  0xd9   :  { %798 = vmatmul.msk.bf16.gmra.mxu2 %vm376_vm1, %v337_v30 }
  0xda   :  { %v282_v31 = vpop.f32.mrf.mxu3 }
  0xdb   :  { %v283_v38 = vadd.f32 %v994_v23, %v282_v31 }
  0xdc   :  { %v239_v33 = vpop.f32.mrf.mxu0 }
  0xdd   :  { %v240_v34 = vadd.f32 %v994_v23, %v239_v33  ;;  %v320_v43 = vmax.f32 %v283_v38, 0.0 }
  0xdf   :  { %v303_v36 = vmax.f32 %v240_v34, 0.0 }
  0xe1   :  { %v329_v39 = vpack.c.bf16 %v303_v36, %v302_v35 }
  0xe2   :  { %v284_v40 = vpop.f32.mrf.mxu3 }
  0xe3   :  { %v285_v41 = vadd.f32 %v994_v23, %v284_v40  ;;  %790 = vmatmul.msk.bf16.gmra.mxu1 %vm376_vm1, %v329_v39 }
  0xe4   :  { %v242_v42 = vpop.f32.mrf.mxu0 }
  0xe5   :  { %v321_v44 = vmax.f32 %v285_v41, 0.0  ;;  %v243_v47 = vadd.f32 %v994_v23, %v242_v42 }
  0xe7   :  { %v338_v45 = vpack.c.bf16 %v321_v44, %v320_v43  ;;  %v304_v50 = vmax.f32 %v243_v47, 0.0 }
  0xe9   :  { %799 = vmatmul.msk.bf16.gmra.mxu2 %vm376_vm1, %v338_v45 }
  0xea   :  { %v287_v46 = vpop.f32.mrf.mxu3 }
  0xeb   :  { %v288_v52 = vadd.f32 %v994_v23, %v287_v46 }
  0xec   :  { %v244_v48 = vpop.f32.mrf.mxu0 }
  0xed   :  { %v245_v49 = vadd.f32 %v994_v23, %v244_v48  ;;  %v322_v57 = vmax.f32 %v288_v52, 0.0 }
  0xef   :  { %v305_v51 = vmax.f32 %v245_v49, 0.0 }
  0xf1   :  { %v330_v53 = vpack.c.bf16 %v305_v51, %v304_v50 }
  0xf2   :  { %v289_v54 = vpop.f32.mrf.mxu3 }
  0xf3   :  { %v290_v55 = vadd.f32 %v994_v23, %v289_v54  ;;  %791 = vmatmul.msk.bf16.gmra.mxu1 %vm376_vm1, %v330_v53 }
  0xf4   :  { %v247_v56 = vpop.f32.mrf.mxu0 }
  0xf5   :  { %v323_v58 = vmax.f32 %v290_v55, 0.0  ;;  %v248_v60 = vadd.f32 %v994_v23, %v247_v56 }
  0xf7   :  { %v339_v59 = vpack.c.bf16 %v323_v58, %v322_v57  ;;  %v306_v63 = vmax.f32 %v248_v60, 0.0 }
  0xf9   :  { %800 = vmatmul.msk.bf16.gmra.mxu2 %vm376_vm1, %v339_v59 }
  0xfc   :  { %v249_v61 = vpop.f32.mrf.mxu0 }
  0xfd   :  { %v250_v62 = vadd.f32 %v994_v23, %v249_v61 }
  0xff   :  { %v307_v0 = vmax.f32 %v250_v62, 0.0 }
 0x101   :  { %v331_v1 = vpack.c.bf16 %v307_v0, %v306_v63 }
 0x103   :  { %792 = vmatmul.msk.bf16.gmra.mxu1 %vm376_vm1, %v331_v1 }
 0x104   :  { %v252_v2 = vpop.f32.mrf.mxu0 }
 0x105   :  { %v253_v3 = vadd.f32 %v994_v23, %v252_v2 }
 0x107   :  { %v308_v5 = vmax.f32 %v253_v3, 0.0 }
 0x10c   :  { %v254_v4 = vpop.f32.mrf.mxu0 }
 0x10d   :  { %v255_v6 = vadd.f32 %v994_v23, %v254_v4 }
 0x10f   :  { %v309_v7 = vmax.f32 %v255_v6, 0.0 }
 0x110   :  { %v434_v8 = vpop.f32.mrf.mxu1 }
 0x111   :  { %v332_v9 = vpack.c.bf16 %v309_v7, %v308_v5  ;;  %v435_v11 = vadd.f32 %v1048_v10, %v434_v8 }
 0x113   :  { %793 = vmatmul.msk.bf16.gmra.mxu1 %vm376_vm1, %v332_v9  ;;  %v514_v14 = vmax.f32 %v435_v11, 0.0 }
 0x118   :  { %v436_v12 = vpop.f32.mrf.mxu1 }
 0x119   :  { %v437_v13 = vadd.f32 %v1048_v10, %v436_v12 }
 0x11b   :  { %v515_v15 = vmax.f32 %v437_v13, 0.0 }
 0x11d   :  { %v1053_v16 = vpack.c.bf16 %v515_v15, %v514_v14 }
 0x120   :  { %v439_v23 = vpop.f32.mrf.mxu1 }
 0x121   :  { %v440_v17 = vadd.f32 %v1048_v10, %v439_v23 }
 0x123   :  { %794 = vmatmul.msk.bf16.gmra.mxu1 %vm376_vm1, %v1002_v37  ;;  %v516_v20 = vmax.f32 %v440_v17, 0.0 }
 0x128   :  { %v441_v18 = vpop.f32.mrf.mxu1 }
 0x129   :  { %v442_v19 = vadd.f32 %v1048_v10, %v441_v18 }
 0x12b   :  { %v517_v21 = vmax.f32 %v442_v19, 0.0 }
 0x12c   :  { %v484_v22 = vpop.f32.mrf.mxu2 }
 0x12d   :  { %v1059_v24 = vpack.c.bf16 %v517_v21, %v516_v20  ;;  %v485_v26 = vadd.f32 %v1048_v10, %v484_v22 }
 0x12f   :  { %v534_v29 = vmax.f32 %v485_v26, 0.0 }
 0x130   :  { %v444_v25 = vpop.f32.mrf.mxu1 }
 0x131   :  { %v445_v30 = vadd.f32 %v1048_v10, %v444_v25 }
 0x133   :  { %v518_v34 = vmax.f32 %v445_v30, 0.0 }
 0x134   :  { %v486_v27 = vpop.f32.mrf.mxu2 }
 0x135   :  { %v487_v28 = vadd.f32 %v1048_v10, %v486_v27 }
 0x137   :  { %v535_v37 = vmax.f32 %v487_v28, 0.0 }
 0x138   :  { %v446_v31 = vpop.f32.mrf.mxu1 }
 0x139   :  { %v447_v32 = vadd.f32 %v1048_v10, %v446_v31  ;;  %v1065_v33 = vpack.c.bf16 %v535_v37, %v534_v29 }
 0x13b   :  { %v519_v35 = vmax.f32 %v447_v32, 0.0 }
 0x13c   :  { %v489_v36 = vpop.f32.mrf.mxu2 }
 0x13d   :  { %v1067_v38 = vpack.c.bf16 %v519_v35, %v518_v34  ;;  %v490_v40 = vadd.f32 %v1048_v10, %v489_v36 }
 0x13f   :  { %v536_v43 = vmax.f32 %v490_v40, 0.0 }
 0x140   :  { %v449_v39 = vpop.f32.mrf.mxu1 }
 0x141   :  { %v450_v44 = vadd.f32 %v1048_v10, %v449_v39 }
 0x143   :  { %v520_v49 = vmax.f32 %v450_v44, 0.0 }
 0x144   :  { %v491_v41 = vpop.f32.mrf.mxu2 }
 0x145   :  { %v492_v42 = vadd.f32 %v1048_v10, %v491_v41 }
 0x147   :  { %v537_v45 = vmax.f32 %v492_v42, 0.0 }
 0x148   :  { %v451_v46 = vpop.f32.mrf.mxu1 }
 0x149   :  { %v452_v47 = vadd.f32 %v1048_v10, %v451_v46  ;;  %v1073_v48 = vpack.c.bf16 %v537_v45, %v536_v43 }
 0x14b   :  { %v521_v50 = vmax.f32 %v452_v47, 0.0 }
 0x14c   :  { %v494_v51 = vpop.f32.mrf.mxu2 }
 0x14d   :  { %v1075_v52 = vpack.c.bf16 %v521_v50, %v520_v49  ;;  %v495_v54 = vadd.f32 %v1048_v10, %v494_v51 }
 0x14f   :  { %v538_v57 = vmax.f32 %v495_v54, 0.0 }
 0x150   :  { %v454_v53 = vpop.f32.mrf.mxu1 }
 0x151   :  { %v455_v58 = vadd.f32 %v1048_v10, %v454_v53 }
 0x153   :  { %v522_v63 = vmax.f32 %v455_v58, 0.0 }
 0x154   :  { %v496_v55 = vpop.f32.mrf.mxu2 }
 0x155   :  { %v497_v56 = vadd.f32 %v1048_v10, %v496_v55 }
 0x157   :  { %v539_v59 = vmax.f32 %v497_v56, 0.0 }
 0x158   :  { %v456_v60 = vpop.f32.mrf.mxu1 }
 0x159   :  { %v457_v61 = vadd.f32 %v1048_v10, %v456_v60  ;;  %v559_v62 = vpack.c.bf16 %v539_v59, %v538_v57 }
 0x15b   :  { %v523_v0 = vmax.f32 %v457_v61, 0.0  ;;  %v611_v60 = vsel %vm570_vm2, %v559_v62, 0 }
 0x15c   :  { %v499_v1 = vpop.f32.mrf.mxu2 }
 0x15d   :  { %v551_v2 = vpack.c.bf16 %v523_v0, %v522_v63  ;;  %v500_v41 = vadd.f32 %v1048_v10, %v499_v1  ;;  %v608_v63 = vsel %vm570_vm2, %v1073_v48, 0 }
 0x15f   :  { %v540_v47 = vmax.f32 %v500_v41, 0.0  ;;  %v587_v61 = vsel %vm570_vm2, %v551_v2, 0  ;;  %v605_v2 = vsel %vm570_vm2, %v1065_v33, 0 }
 0x160   :  { %v459_v3 = vpop.f32.mrf.mxu1 }
 0x161   :  { %v460_v49 = vadd.f32 %v1048_v10, %v459_v3  ;;  %v584_v3 = vsel %vm570_vm2, %v1075_v52, 0 }
 0x163   :  { %v524_v55 = vmax.f32 %v460_v49, 0.0 }
 0x164   :  { %v501_v4 = vpop.f32.mrf.mxu2 }
 0x165   :  { %v502_v34 = vadd.f32 %v1048_v10, %v501_v4  ;;  %v563_v4 = vld [vmem:[#allocation2] sm:$0x1] }
 0x167   :  { %v541_v43 = vmax.f32 %v502_v34, 0.0 }
 0x168   :  { %v461_v5 = vpop.f32.mrf.mxu1 }
 0x169   :  { %v462_v44 = vadd.f32 %v1048_v10, %v461_v5  ;;  %v560_v53 = vpack.c.bf16 %v541_v43, %v540_v47  ;;  %v868_v5 = vmov 0  }
 0x16a   :  { %831 = vset.pattern.permute.xlu0 %v868_v5 }
 0x16b   :  { %v525_v50 = vmax.f32 %v462_v44, 0.0  ;;  %v614_v56 = vsel %vm570_vm2, %v560_v53, 0  ;;  %566 = vperm.xlu0 %831, %v563_v4  }
 0x16c   :  { %v504_v6 = vpop.f32.mrf.mxu2 }
 0x16d   :  { %v505_v21 = vadd.f32 %v1048_v10, %v504_v6  ;;  %v552_v57 = vpack.c.bf16 %v525_v50, %v524_v55 }
 0x16f   :  { %v542_v37 = vmax.f32 %v505_v21, 0.0  ;;  %v590_v58 = vsel %vm570_vm2, %v552_v57, 0 }
 0x170   :  { %v464_v7 = vpop.f32.mrf.mxu1 }
 0x171   :  { %v465_v31 = vadd.f32 %v1048_v10, %v464_v7 }
 0x173   :  { %v526_v42 = vmax.f32 %v465_v31, 0.0  ;;  %v664_v31 = vlaneseq }
 0x174   :  { %v506_v8 = vpop.f32.mrf.mxu2 }
 0x175   :  { %v507_v23 = vadd.f32 %v1048_v10, %v506_v8  ;;  %v581_v8 = vsel %vm570_vm2, %v1067_v38, 0  ;;  %v575_v38 = vsel %vm570_vm2, %v1053_v16, 0  ;;  %vm666_vm4 = vcmp.lt.s32.totalorder %v664_v31, 256 }
 0x177   :  { %v543_v26 = vmax.f32 %v507_v23, 0.0 }
 0x178   :  { %v466_v9 = vpop.f32.mrf.mxu1 }
 0x179   :  { %v467_v27 = vadd.f32 %v1048_v10, %v466_v9  ;;  %v561_v39 = vpack.c.bf16 %v543_v26, %v542_v37 }
 0x17b   :  { %v527_v35 = vmax.f32 %v467_v27, 0.0  ;;  %v617_v45 = vsel %vm570_vm2, %v561_v39, 0 }
 0x17c   :  { %v509_v11 = vpop.f32.mrf.mxu2 }
 0x17d   :  { %v510_v13 = vadd.f32 %v1048_v10, %v509_v11  ;;  %v553_v46 = vpack.c.bf16 %v527_v35, %v526_v42 }
 0x17f   :  { %v544_v17 = vmax.f32 %v510_v13, 0.0  ;;  %v593_v51 = vsel %vm570_vm2, %v553_v46, 0 }
 0x180   :  { %v469_v12 = vpop.f32.mrf.mxu1 }
 0x181   :  { %v470_v18 = vadd.f32 %v1048_v10, %v469_v12 }
 0x183   :  { %v528_v28 = vmax.f32 %v470_v18, 0.0 }
 0x184   :  { %v511_v14 = vpop.f32.mrf.mxu2 }
 0x185   :  { %v512_v15 = vadd.f32 %v1048_v10, %v511_v14  ;;  %v578_v14 = vsel %vm570_vm2, %v1059_v24, 0 }
 0x187   :  { %v545_v19 = vmax.f32 %v512_v15, 0.0 }
 0x188   :  { %v471_v20 = vpop.f32.mrf.mxu1 }
 0x189   :  { %v472_v22 = vadd.f32 %v1048_v10, %v471_v20  ;;  %v562_v25 = vpack.c.bf16 %v545_v19, %v544_v17 }
 0x18b   :  { %v529_v29 = vmax.f32 %v472_v22, 0.0  ;;  %v620_v30 = vsel %vm570_vm2, %v562_v25, 0 }
 0x18c   :  { %635 = vmatpush.bf16.xpose.msrb.mxu3 %v620_v30 }
 0x18d   :  { %v554_v32 = vpack.c.bf16 %v529_v29, %v528_v28 }
 0x18f   :  { %v596_v36 = vsel %vm570_vm2, %v554_v32, 0 }
 0x190   :  { %v474_v40 = vpop.f32.mrf.mxu1  ;;  %622 = vmatpush.bf16.xpose.msrb.mxu2 %v596_v36 }
 0x191   :  { %v475_v52 = vadd.f32 %v1048_v10, %v474_v40 }
 0x193   :  { %v530_v13 = vmax.f32 %v475_v52, 0.0 }
 0x194   :  { %636 = vmatpush.bf16.xpose.msrb.mxu3 %v617_v45 }
 0x198   :  { %v476_v54 = vpop.f32.mrf.mxu1  ;;  %623 = vmatpush.bf16.xpose.msrb.mxu2 %v593_v51 }
 0x199   :  { %v477_v7 = vadd.f32 %v1048_v10, %v476_v54 }
 0x19b   :  { %v531_v11 = vmax.f32 %v477_v7, 0.0 }
 0x19c   :  { %637 = vmatpush.bf16.xpose.msrb.mxu3 %v614_v56 }
 0x19d   :  { %v555_v33 = vpack.c.bf16 %v531_v11, %v530_v13 }
 0x19f   :  { %v599_v15 = vsel %vm570_vm2, %v555_v33, 0 }
 0x1a0   :  { %624 = vmatpush.bf16.xpose.msrb.mxu2 %v590_v58  ;;  %v479_v59 = vpop.f32.mrf.mxu1 }
 0x1a1   :  { %v480_v62 = vadd.f32 %v1048_v10, %v479_v59 }
 0x1a3   :  { %v532_v48 = vmax.f32 %v480_v62, 0.0 }
 0x1a4   :  { %638 = vmatpush.bf16.xpose.msrb.mxu3 %v611_v60 }
 0x1a8   :  { %625 = vmatpush.bf16.xpose.msrb.mxu2 %v587_v61  ;;  %v481_v0 = vpop.f32.mrf.mxu1 }
 0x1a9   :  { %v482_v1 = vadd.f32 %v1048_v10, %v481_v0  ;;  %v546_v10 = vld [vmem:[%s1132_s5] sm:$0x1]  ;;  %s869_s5 = smov [#allocation3]  }
 0x1aa   :  { %s674_s20 = sshll.u32 %s869_s5, 4  ;;  %s675_s20 = int_to_ptr.vmem [resolvable:$true] %s674_s20 }
 0x1ab   :  { %v533_v6 = vmax.f32 %v482_v1, 0.0 }
 0x1ac   :  { %639 = vmatpush.bf16.xpose.msrb.mxu3 %v608_v63 }
 0x1ad   :  { %v556_v9 = vpack.c.bf16 %v533_v6, %v532_v48 }
 0x1af   :  { %v602_v12 = vsel %vm570_vm2, %v556_v9, 0 }
 0x1b0   :  { %626 = vmatpush.bf16.xpose.msrb.mxu2 %v584_v3 }
 0x1b4   :  { %640 = vmatpush.bf16.xpose.msrb.mxu3 %v605_v2 }
 0x1b8   :  { %627 = vmatpush.bf16.xpose.msrb.mxu2 %v581_v8 }
 0x1bc   :  { %641 = vmatpush.bf16.xpose.msrb.mxu3 %v602_v12 }
 0x1c0   :  { %628 = vmatpush.bf16.xpose.msrb.mxu2 %v578_v14 }
 0x1c4   :  { %642 = vmatpush.bf16.xpose.msrb.mxu3 %v599_v15 }
 0x1c8   :  { %629 = vmatpush.bf16.xpose.msrb.mxu2 %v575_v38 }
 0x1cb   :  { %802 = vmatmul.msk.bf16.vlgmr.msrb.gmra.mxu3 %vm570_vm2, %v546_v10 }
 0x1cf   :  { %801 = vmatmul.msk.bf16.vlgmr.msrb.gmra.mxu2 %vm570_vm2, %v546_v10 }
 0x1dd   :  { %v567_v23 = vpop.permute.xlu0 %566 }
 0x1de   :  { %v569_v17 = vperm.slane %v567_v23, 0 }
 0x24e   :  { %v644_v24 = vpop.f32.mrf.mxu3 }
 0x24f   :  { %v645_v18 = vadd.f32 %v644_v24, %v569_v17 }
 0x251   :  { %v649_v19 = vsub.f32 0.0, %v645_v18 }
 0x252   :  { %v631_v20 = vpop.f32.mrf.mxu2 }
 0x253   :  { %v632_v21 = vadd.f32 %v631_v20, %v569_v17  ;;  %v652_v22 = vmul.f32 1.442695, %v649_v19 }
 0x255   :  { %v648_v25 = vsub.f32 0.0, %v632_v21  ;;  %834 = vpow2.f32 %v652_v22 }
 0x256   :  { %v646_v16 = vpop.f32.mrf.mxu3 }
 0x257   :  { %v650_v26 = vmul.f32 1.442695, %v648_v25 }
 0x259   :  { %836 = vpow2.f32 %v650_v26 }
 0x25a   :  { %v633_v27 = vpop.f32.mrf.mxu2 }
 0x25b   :  { %v835_v28 = vpop.eup %834 }
 0x25c   :  { %v655_v29 = vadd.f32 1.0, %v835_v28 }
 0x25e   :  { %838 = vrcp.f32 %v655_v29 }
 0x25f   :  { %v837_v30 = vpop.eup %836 }
 0x260   :  { %v654_v37 = vadd.f32 1.0, %v837_v30 }
 0x262   :  { %840 = vrcp.f32 %v654_v37 }
 0x264   :  { %v839_v32 = vpop.eup %838 }
 0x265   :  { %v660_v34 = vrot.slane %v839_v32, 7 }
 0x268   :  { %v841_v35 = vpop.eup %840 }
 0x269   :  { %v662_v36 = vsel %vm661_vm3, %v841_v35, %v660_v34 }
 0x26a   :  { %668 = vst.msk [vmem:[#allocation3] sm:$0x3] %vm666_vm4, %v662_v36 }
 0x26b   :  { %679 = dma.vmem_to_hbm [thread:$0]  %s675_s20, 32, %s677_s23, [#allocation4]  }
 0x26c   :  { %866 = dma.done.wait [#allocation4], 32  }
 0x26d   :  { %867 = vsyncadd [#allocation4], 4294967264 }
 0x26e   :  { %684 = vsyncpa [#allocation4], 1 }

</bundles_post_ra>
